<compile_context>
chip_gen: v7x
topology: tpu7x:2x2x1
jax: 0.10.0
libtpu: 0.0.40
codegen_flags: <defaults>
</compile_context>

<pallas_src>
import jax
import jax.numpy as jnp
import numpy as np
from jax.experimental import pallas as pl
from jax.experimental.pallas import tpu as pltpu


def _round_up(x, m):
    return ((x + m - 1) // m) * m


# ----------------------------------------------------------------------------
# Single fused kernel: both packed matmuls + temperature-scale epilogue.
# ----------------------------------------------------------------------------
def _fused_forward_kernel(rgb_ref, depth_ref, w_rgb_ref, w_depth_ref,
                          inv_t_ref, o_ref):
    acc = jnp.dot(rgb_ref[...], w_rgb_ref[...],
                  preferred_element_type=jnp.float32)
    acc = acc + jnp.dot(depth_ref[...], w_depth_ref[...],
                        preferred_element_type=jnp.float32)
    # One lane-dense store; (1, out_cols) row broadcasts over the row tile.
    o_ref[...] = (acc * inv_t_ref[...]).astype(o_ref.dtype)


# ----------------------------------------------------------------------------
# One-time weight packing (cache across forward calls / calibration steps).
# ----------------------------------------------------------------------------
def pack_backbone_weights(params, use_bf16=False):
    w_fused = jnp.asarray(params["w_fused"], jnp.float32)   # [2*feat, C]
    w_rgb = jnp.asarray(params["w_rgb"], jnp.float32)       # [feat, C]
    w_depth = jnp.asarray(params["w_depth"], jnp.float32)   # [feat, C]
    feat, num_classes = w_rgb.shape
    assert w_fused.shape[0] == 2 * feat and w_depth.shape == (feat, num_classes)

    # Lane-dense output width: all three heads packed into one slab.
    out_cols = _round_up(3 * num_classes, 128)
    dt = jnp.bfloat16 if use_bf16 else jnp.float32

    w_from_rgb = jnp.zeros((feat, out_cols), jnp.float32)
    w_from_rgb = w_from_rgb.at[:, 0:num_classes].set(w_fused[:feat])
    w_from_rgb = w_from_rgb.at[:, num_classes:2 * num_classes].set(w_rgb)

    w_from_depth = jnp.zeros((feat, out_cols), jnp.float32)
    w_from_depth = w_from_depth.at[:, 0:num_classes].set(w_fused[feat:])
    w_from_depth = w_from_depth.at[:, 2 * num_classes:3 * num_classes].set(w_depth)

    return {
        "w_from_rgb": w_from_rgb.astype(dt),
        "w_from_depth": w_from_depth.astype(dt),
        "feat": feat,
        "num_classes": num_classes,
        "out_cols": out_cols,
        "compute_dtype": dt,
    }


def _pick_tile_n(n, feat, out_cols, itemsize):
    """Row-tile size under a conservative VMEM budget (safe on v5e/v6e/v7x)."""
    tile = min(512, _round_up(max(n, 1), 8))
    # v7x megacore: keep at least 2 grid steps when the batch allows it.
    if n > 8:
        tile = min(tile, _round_up((n + 1) // 2, 8))

    # Double-buffered activations (2 inputs) + single-buffered weight slabs
    # (pl.Buffered(1)) + double-buffered f32 output.
    weight_bytes = 2 * feat * out_cols * itemsize

    def footprint(t):
        return 2 * 2 * t * feat * itemsize + 2 * t * out_cols * 4 + weight_bytes

    budget = 12 * 1024 * 1024   # under v5e's 16 MiB default scoped VMEM
    while tile > 8 and footprint(tile) > budget:
        tile = max(8, _round_up(tile // 2, 8))
    # TODO(synk): for backbones where the weight slabs alone exceed the budget
    # (feat >> 8k), add a K-axis grid dimension ("arbitrary") with a VMEM
    # accumulator + pl.when init/finalize instead of shrinking tile_n further.
    return tile, footprint(tile)


# ----------------------------------------------------------------------------
# ModelWithTemperature.forward (synthetic wrapped model + temp scaling), fused.
# ----------------------------------------------------------------------------
def model_with_temperature_forward(rgb, depth, packed,
                                   depth_rgb_temperature,
                                   rgb_temperature,
                                   depth_temperature):
    """rgb, depth: [N, C, H, W] float32 (NCHW, like PyTorch)."""
    n = rgb.shape[0]
    feat = packed["feat"]
    num_classes = packed["num_classes"]
    out_cols = packed["out_cols"]
    dt = packed["compute_dtype"]

    rgb_flat = rgb.reshape(n, -1).astype(dt)      # == torch .view(N, -1)
    depth_flat = depth.reshape(n, -1).astype(dt)
    assert rgb_flat.shape[1] == feat and depth_flat.shape[1] == feat

    # (1, out_cols) inverse-temperature lane row: cols [0,C)->1/T_fused,
    # [C,2C)->1/T_rgb, [2C,3C)->1/T_depth, rest 0.  Rebuilt per call (tiny);
    # the big weight slabs are cached in `packed`.
    inv_f = 1.0 / jnp.asarray(depth_rgb_temperature, jnp.float32).reshape(())
    inv_r = 1.0 / jnp.asarray(rgb_temperature, jnp.float32).reshape(())
    inv_d = 1.0 / jnp.asarray(depth_temperature, jnp.float32).reshape(())
    seg = jnp.arange(out_cols) // num_classes
    inv_row = jnp.where(
        seg == 0, inv_f,
        jnp.where(seg == 1, inv_r,
                  jnp.where(seg == 2, inv_d, 0.0))).astype(jnp.float32)[None, :]

    itemsize = 2 if dt == jnp.bfloat16 else 4
    tile_n, vmem_bytes = _pick_tile_n(n, feat, out_cols, itemsize)
    grid = (pl.cdiv(n, tile_n),)   # ragged last block handled by Pallas

    compiler_kwargs = dict(dimension_semantics=("parallel",))
    if vmem_bytes > 12 * 1024 * 1024:
        compiler_kwargs["vmem_limit_bytes"] = int(
            min(vmem_bytes + (4 << 20), 56 << 20))

    out = pl.pallas_call(
        _fused_forward_kernel,
        out_shape=jax.ShapeDtypeStruct((n, out_cols), jnp.float32),
        grid=grid,
        in_specs=[
            pl.BlockSpec((tile_n, feat), lambda i: (i, 0)),
            pl.BlockSpec((tile_n, feat), lambda i: (i, 0)),
            # Constant weight blocks: single-buffered (no re-DMA across steps).
            pl.BlockSpec((feat, out_cols), lambda i: (0, 0),
                         pipeline_mode=pl.Buffered(1)),
            pl.BlockSpec((feat, out_cols), lambda i: (0, 0),
                         pipeline_mode=pl.Buffered(1)),
            pl.BlockSpec((1, out_cols), lambda i: (0, 0)),
        ],
        out_specs=pl.BlockSpec((tile_n, out_cols), lambda i: (i, 0)),
        compiler_params=pltpu.CompilerParams(**compiler_kwargs),
    )(rgb_flat, depth_flat, packed["w_from_rgb"], packed["w_from_depth"],
      inv_row)

    depth_rgb_logits = out[:, 0:num_classes]
    rgb_logits = out[:, num_classes:2 * num_classes]
    depth_logits = out[:, 2 * num_classes:3 * num_classes]
    return depth_rgb_logits, rgb_logits, depth_logits


if __name__ == "__main__":
    N, C, H, W = 2, 4, 16, 16
    NUM_CLASSES = 10

    key = jax.random.PRNGKey(0)
    k_rgb, k_depth, k_wf, k_wr, k_wd = jax.random.split(key, 5)

    rgb = jax.random.normal(k_rgb, (N, C, H, W), dtype=jnp.float32)
    depth = jax.random.normal(k_depth, (N, C, H, W), dtype=jnp.float32)

    feat = C * H * W
    params = {
        # deterministic synthetic backbone weights (stand-in for self.model)
        "w_fused": jax.random.normal(k_wf, (2 * feat, NUM_CLASSES), jnp.float32) * 0.02,
        "w_rgb": jax.random.normal(k_wr, (feat, NUM_CLASSES), jnp.float32) * 0.02,
        "w_depth": jax.random.normal(k_wd, (feat, NUM_CLASSES), jnp.float32) * 0.02,
        # nn.Parameter(torch.ones(1) * 1.5) for each modality
        "depth_rgb_temperature": jnp.float32(1.5),
        "rgb_temperature": jnp.float32(1.5),
        "depth_temperature": jnp.float32(1.5),
    }

    # One-time packing; reuse across calibration forward calls.
    packed = pack_backbone_weights(params, use_bf16=False)

    outs = model_with_temperature_forward(
        rgb, depth, packed,
        params["depth_rgb_temperature"],
        params["rgb_temperature"],
        params["depth_temperature"])
    outs = jax.block_until_ready(outs)

    # Pure-JAX reference of the full forward (fused head via explicit concat).
    rgb_flat = rgb.reshape(N, -1)
    depth_flat = depth.reshape(N, -1)
    fused_flat = jnp.concatenate([rgb_flat, depth_flat], axis=1)
    ref = (
        (fused_flat @ params["w_fused"]) / 1.5,
        (rgb_flat @ params["w_rgb"]) / 1.5,
        (depth_flat @ params["w_depth"]) / 1.5,
    )
    for got, want in zip(outs, ref):
        np.testing.assert_allclose(np.asarray(got), np.asarray(want),
                                   rtol=1e-5, atol=1e-5)

    # TODO(synk): set_temperature / _ECELoss are host-driven LBFGS calibration
    # utilities (data-dependent binning + optimizer loop), not part of
    # forward(); not implemented as kernels.
    print("KERNEL_OK")
</pallas_src>

<mosaic_0001>
module attributes {stable_mosaic.version = 11 : i64} {
  func.func @_fused_forward_kernel(%arg0: i32, %arg1: memref<8x1024xf32, #tpu.memory_space<vmem>>, %arg2: memref<8x1024xf32, #tpu.memory_space<vmem>>, %arg3: memref<1024x128xf32, #tpu.memory_space<vmem>>, %arg4: memref<1024x128xf32, #tpu.memory_space<vmem>>, %arg5: memref<1x128xf32, #tpu.memory_space<vmem>>, %arg6: memref<8x128xf32, #tpu.memory_space<vmem>>) attributes {dimension_semantics = [#tpu.dimension_semantics<parallel>], iteration_bounds = array<i64: 1>, scalar_prefetch = 0 : i64, scratch_operands = 0 : i64, tpu.core_type = #tpu.core_type<tc>, window_params = [{transform_indices = @transform_0, window_bounds = array<i64: 8, 1024>}, {transform_indices = @transform_1, window_bounds = array<i64: 8, 1024>}, {pipeline_mode = #tpu.pipeline_mode<synchronous>, transform_indices = @transform_2, window_bounds = array<i64: 1024, 128>}, {pipeline_mode = #tpu.pipeline_mode<synchronous>, transform_indices = @transform_3, window_bounds = array<i64: 1024, 128>}, {pipeline_mode = #tpu.pipeline_mode<synchronous>, transform_indices = @transform_4, window_bounds = array<i64: 1, 128>}, {transform_indices = @transform_5, window_bounds = array<i64: 8, 128>}]} {
    %c0 = arith.constant 0 : index
    %c0_0 = arith.constant 0 : index
    %0 = vector.load %arg1[%c0, %c0_0] : memref<8x1024xf32, #tpu.memory_space<vmem>>, vector<8x1024xf32>
    %c0_1 = arith.constant 0 : index
    %c0_2 = arith.constant 0 : index
    %1 = vector.load %arg3[%c0_1, %c0_2] : memref<1024x128xf32, #tpu.memory_space<vmem>>, vector<1024x128xf32>
    %cst = arith.constant dense<0.000000e+00> : vector<8x128xf32>
    %2 = tpu.matmul %0, %1, %cst {dimension_numbers = #tpu.dot_dimension_numbers<[1], [0], [0], [1], [0, 0, 1, 1], [], []>} : vector<8x1024xf32>, vector<1024x128xf32>, vector<8x128xf32> -> vector<8x128xf32>
    %c0_3 = arith.constant 0 : index
    %c0_4 = arith.constant 0 : index
    %3 = vector.load %arg2[%c0_3, %c0_4] : memref<8x1024xf32, #tpu.memory_space<vmem>>, vector<8x1024xf32>
    %c0_5 = arith.constant 0 : index
    %c0_6 = arith.constant 0 : index
    %4 = vector.load %arg4[%c0_5, %c0_6] : memref<1024x128xf32, #tpu.memory_space<vmem>>, vector<1024x128xf32>
    %cst_7 = arith.constant dense<0.000000e+00> : vector<8x128xf32>
    %5 = tpu.matmul %3, %4, %cst_7 {dimension_numbers = #tpu.dot_dimension_numbers<[1], [0], [0], [1], [0, 0, 1, 1], [], []>} : vector<8x1024xf32>, vector<1024x128xf32>, vector<8x128xf32> -> vector<8x128xf32>
    %6 = arith.addf %2, %5 : vector<8x128xf32>
    %c0_8 = arith.constant 0 : index
    %c0_9 = arith.constant 0 : index
    %7 = vector.load %arg5[%c0_8, %c0_9] : memref<1x128xf32, #tpu.memory_space<vmem>>, vector<1x128xf32>
    %8 = vector.broadcast %7 : vector<1x128xf32> to vector<8x128xf32>
    %9 = arith.mulf %6, %8 : vector<8x128xf32>
    %c0_10 = arith.constant 0 : index
    %c0_11 = arith.constant 0 : index
    %10 = vector.load %arg6[%c0_10, %c0_11] : memref<8x128xf32, #tpu.memory_space<vmem>>, vector<8x128xf32>
    tpu.vector_store %arg6[%c0_10, %c0_11], %9 {strides = array<i32>} : memref<8x128xf32, #tpu.memory_space<vmem>>, vector<8x128xf32>,
    return
  }
  func.func @transform_0(%arg0: i32) -> (i32, i32) {
    %c0_i32 = arith.constant 0 : i32
    %c0_i32_0 = arith.constant 0 : i32
    return %arg0, %c0_i32 : i32, i32
  }
  func.func @transform_1(%arg0: i32) -> (i32, i32) {
    %c0_i32 = arith.constant 0 : i32
    %c0_i32_0 = arith.constant 0 : i32
    return %arg0, %c0_i32 : i32, i32
  }
  func.func @transform_2(%arg0: i32) -> (i32, i32) {
    %c0_i32 = arith.constant 0 : i32
    %c0_i32_0 = arith.constant 0 : i32
    %c0_i32_1 = arith.constant 0 : i32
    return %c0_i32, %c0_i32_0 : i32, i32
  }
  func.func @transform_3(%arg0: i32) -> (i32, i32) {
    %c0_i32 = arith.constant 0 : i32
    %c0_i32_0 = arith.constant 0 : i32
    %c0_i32_1 = arith.constant 0 : i32
    return %c0_i32, %c0_i32_0 : i32, i32
  }
  func.func @transform_4(%arg0: i32) -> (i32, i32) {
    %c0_i32 = arith.constant 0 : i32
    %c0_i32_0 = arith.constant 0 : i32
    %c0_i32_1 = arith.constant 0 : i32
    return %c0_i32, %c0_i32_0 : i32, i32
  }
  func.func @transform_5(%arg0: i32) -> (i32, i32) {
    %c0_i32 = arith.constant 0 : i32
    %c0_i32_0 = arith.constant 0 : i32
    return %arg0, %c0_i32 : i32, i32
  }
}

</mosaic_0001>

<bundles_post_ra>
// kernel: tpu_custom_call.1
= control target key start
LH: loop header
LB: loop body
LE: loop exit
PB: predicated region body
PF: predicated region fallthrough
CT: control target
= control target key end

     0   :  { %10 = vsyncpa [#allocation3], 0  ;;  %s1981_s0 = inlined_call_operand.hbm [shape: f32[2,1024], index: 0, kind: input, shape index: {}]   ;;  %s1982_s1 = inlined_call_operand.hbm [shape: f32[2,1024], index: 1, kind: input, shape index: {}]   ;;  %s1983_s2 = inlined_call_operand.hbm [shape: f32[1024,128], index: 2, kind: input, shape index: {}]   ;;  %s1984_s3 = inlined_call_operand.hbm [shape: f32[1024,128], index: 3, kind: input, shape index: {}]   ;;  %s1985_s4 = inlined_call_operand.vmem [shape: f32[1,128], index: 4, kind: input, shape index: {}]   ;;  %s1986_s5 = inlined_call_operand.hbm [shape: f32[2,128], index: 5, kind: output, shape index: {}]  }
   0x1   :  { %11 = vsyncpa [#allocation6], 0 }
   0x2   :  { %12 = vsyncpa [#allocation9], 0 }
   0x3   :  { %13 = vsyncpa [#allocation4], 0 }
   0x4   :  { %18 = vsyncadd [#allocation3], 768  ;;  %s1803_s18 = smov [#allocation2]   ;;  %s1685_s22 = scalar_lea.hbm %s1981_s0, 256 }
   0x5   :  { %s19_s19 = sshll.u32 %s1803_s18, 4  ;;  %p1686_p0 = scmp.ne.s32.totalorder %s1981_s0, %s1685_s22  ;;  %s20_s19 = int_to_ptr.vmem [resolvable:$true] %s19_s19 }
   0x6   :  { %p1689_p1 = scmp.lt.u32.totalorder %s1685_s22, %s1981_s0 }
   0x8   :  { %p1691_p2 = pnand %p1689_p1, %p1686_p0 }
   0xa   :  { %1694 = shalt.err (!%p1691_p2)
}
   0xb   :  { %s1695_s27 = scalar_lea.vmem %s20_s19, 256  ;;  %s1699_s28 = scalar_lea.vmem %s20_s19, 1024 }
   0xc   :  { %p1696_p3 = scmp.ne.s32.totalorder %s20_s19, %s1695_s27  ;;  %p1700_p4 = scmp.lt.s32.totalorder %s20_s19, %s20_s19 }
   0xd   :  { %p1701_p5 = scmp.lt.s32.totalorder %s1699_s28, %s1695_s27 }
   0xf   :  { %p1702_p6 = por %p1701_p5, %p1700_p4 }
  0x11   :  { %p1703_p7 = pnand %p1702_p6, %p1696_p3 }
  0x13   :  { %1706 = shalt.err (!%p1703_p7)
}
  0x14   :  { %s1804_s29 = smov 256   ;;  %s1805_s30 = smov 16  }
  0x15   :  { %25 = dma.hbm_to_vmem [thread:$0]  %s1981_s0, 256, %s20_s19, [#allocation3], %s1804_s29, %s1804_s29, %s1805_s30  }
  0x16   :  { %30 = vsyncadd [#allocation6], 768  ;;  %s1806_s8 = smov [#allocation5]   ;;  %s1807_s10 = smov [#allocation7]  }
  0x17   :  { %s31_s9 = sshll.u32 %s1806_s8, 4  ;;  %s43_s11 = sshll.u32 %s1807_s10, 4  ;;  %s32_s9 = int_to_ptr.vmem [resolvable:$true] %s31_s9  ;;  %s1857_s11 = int_to_ptr.vmem [resolvable:$true] %s43_s11 }
  0x18   :  { %s1707_s14 = scalar_lea.hbm %s1982_s1, 256 }
  0x19   :  { %p1708_p8 = scmp.ne.s32.totalorder %s1982_s1, %s1707_s14  ;;  %p1711_p9 = scmp.lt.u32.totalorder %s1707_s14, %s1982_s1 }
  0x1b   :  { %p1713_p10 = pnand %p1711_p9, %p1708_p8 }
  0x1d   :  { %1716 = shalt.err (!%p1713_p10)
}
  0x1e   :  { %s1717_s0 = scalar_lea.vmem %s32_s9, 256  ;;  %s1721_s19 = scalar_lea.vmem %s32_s9, 1024 }
  0x1f   :  { %p1718_p11 = scmp.ne.s32.totalorder %s32_s9, %s1717_s0  ;;  %p1722_p12 = scmp.lt.s32.totalorder %s32_s9, %s32_s9 }
  0x20   :  { %p1723_p13 = scmp.lt.s32.totalorder %s1721_s19, %s1717_s0 }
  0x22   :  { %p1724_p0 = por %p1723_p13, %p1722_p12 }
  0x24   :  { %p1725_p1 = pnand %p1724_p0, %p1718_p11 }
  0x26   :  { %1728 = shalt.err (!%p1725_p1)
}
  0x27   :  { %37 = dma.hbm_to_vmem [thread:$0]  %s1982_s1, 256, %s32_s9, [#allocation6], %s1804_s29, %s1804_s29, %s1805_s30  }
  0x28   :  { %s1729_s24 = scalar_lea.hbm %s1983_s2, 16384 }
  0x29   :  { %p1730_p2 = scmp.ne.s32.totalorder %s1983_s2, %s1729_s24  ;;  %p1733_p3 = scmp.lt.u32.totalorder %s1729_s24, %s1983_s2 }
  0x2b   :  { %p1735_p4 = pnand %p1733_p3, %p1730_p2 }
  0x2d   :  { %1738 = shalt.err (!%p1735_p4)
}
  0x2e   :  { %s1739_s6 = scalar_lea.vmem %s1857_s11, 16384  ;;  %p1744_p6 = scmp.lt.s32.totalorder %s1857_s11, %s1857_s11 }
  0x2f   :  { %p1740_p5 = scmp.ne.s32.totalorder %s1857_s11, %s1739_s6  ;;  %p1745_p7 = scmp.lt.s32.totalorder %s1739_s6, %s1739_s6 }
  0x31   :  { %p1746_p8 = por %p1745_p7, %p1744_p6 }
  0x33   :  { %p1747_p9 = pnand %p1746_p8, %p1740_p5 }
  0x35   :  { %1750 = shalt.err (!%p1747_p9)
}
  0x36   :  { %s1808_s1 = smov 128   ;;  %s1809_s29 = smov 8  }
  0x37   :  { %49 = dma.hbm_to_vmem [thread:$0]  %s1983_s2, 16384, %s1857_s11, [#allocation6], %s1808_s1, %s1808_s1, %s1809_s29  }
  0x38   :  { %s1810_s8 = smov [#allocation8]   ;;  %s1751_s13 = scalar_lea.hbm %s1984_s3, 16384 }
  0x39   :  { %s55_s9 = sshll.u32 %s1810_s8, 4  ;;  %p1752_p10 = scmp.ne.s32.totalorder %s1984_s3, %s1751_s13  ;;  %s56_s9 = int_to_ptr.vmem [resolvable:$true] %s55_s9 }
  0x3a   :  { %p1755_p11 = scmp.lt.u32.totalorder %s1751_s13, %s1984_s3 }
  0x3c   :  { %p1757_p12 = pnand %p1755_p11, %p1752_p10 }
  0x3e   :  { %1760 = shalt.err (!%p1757_p12)
}
  0x3f   :  { %s1761_s18 = scalar_lea.vmem %s56_s9, 16384  ;;  %p1766_p0 = scmp.lt.s32.totalorder %s56_s9, %s56_s9 }
  0x40   :  { %p1762_p13 = scmp.ne.s32.totalorder %s56_s9, %s1761_s18  ;;  %p1767_p1 = scmp.lt.s32.totalorder %s1761_s18, %s1761_s18 }
  0x42   :  { %p1768_p2 = por %p1767_p1, %p1766_p0 }
  0x44   :  { %p1769_p3 = pnand %p1768_p2, %p1762_p13 }
  0x46   :  { %1772 = shalt.err (!%p1769_p3)
}
  0x47   :  { %61 = dma.hbm_to_vmem [thread:$0]  %s1984_s3, 16384, %s56_s9, [#allocation9], %s1808_s1, %s1808_s1, %s1809_s29  }
  0x48   :  { %1795 = dma.done.wait [#allocation3], 1024  }
  0x49   :  { %1796 = vsyncadd [#allocation3], 4294966272 }
  0x4a   :  { %1797 = dma.done.wait [#allocation6], 17408  }
  0x4b   :  { %1798 = vsyncadd [#allocation6], 4294949888 }
  0x4c   :  { %1799 = dma.done.wait [#allocation9], 16384  }
  0x4d   :  { %1800 = vsyncadd [#allocation9], 4294950912  ;;  %v236_v0 = vld [vmem:[#allocation8 + $0x80] sm:$0xff]  ;;  %v237_v1 = vld [vmem:[#allocation8 + $0x88] sm:$0xff]  ;;  %v1811_v51 = vmov 1983009808   ;;  %v363_v53 = vlaneseq }
  0x4e   :  { %v268_v2 = vld [vmem:[#allocation8 + $0x180] sm:$0xff]  ;;  %v1393_v3 = vpack.c.bf16 %v237_v1, %v236_v0  ;;  %v269_v4 = vld [vmem:[#allocation8 + $0x188] sm:$0xff]  ;;  %v238_v11 = vld [vmem:[#allocation8 + $0x90] sm:$0xff]  ;;  %v361_v52 = vunpack.c.l.s4 %v1811_v51 }
  0x4f   :  { %v220_v5 = vld [vmem:[#allocation8] sm:$0xff]  ;;  %v221_v6 = vld [vmem:[#allocation8 + $0x8] sm:$0xff]  ;;  %v1425_v7 = vpack.c.bf16 %v269_v4, %v268_v2  ;;  %v239_v13 = vld [vmem:[#allocation8 + $0x98] sm:$0xff] }
  0x50   :  { %v1395_v8 = vpack.c.bf16 %v221_v6, %v220_v5  ;;  %v252_v9 = vld [vmem:[#allocation8 + $0x100] sm:$0xff]  ;;  %v253_v10 = vld [vmem:[#allocation8 + $0x108] sm:$0xff]  ;;  %1394 = vmatprep.subr.bf16.mxu0 %v1393_v3  ;;  %v270_v14 = vld [vmem:[#allocation8 + $0x190] sm:$0xff]  ;;  %v1397_v16 = vpack.c.bf16 %v239_v13, %v238_v11  ;;  %v362_v4 = vunpack.c.0.s8 %v361_v52  ;;  %v364_v5 = vshrl.u32 %v363_v53, 7 }
  0x51   :  { %v1427_v12 = vpack.c.bf16 %v253_v10, %v252_v9  ;;  %v271_v15 = vld [vmem:[#allocation8 + $0x198] sm:$0xff]  ;;  %1426 = vmatprep.subr.bf16.mxu1 %v1425_v7  ;;  %v222_v18 = vld [vmem:[#allocation8 + $0x10] sm:$0xff]  ;;  %v240_v23 = vld [vmem:[#allocation8 + $0xa0] sm:$0xff] }
  0x52   :  { %1396 = vmatpush3.bf16.msra.mxu0 %v1395_v8  ;;  %v1429_v17 = vpack.c.bf16 %v271_v15, %v270_v14  ;;  %v223_v19 = vld [vmem:[#allocation8 + $0x18] sm:$0xff]  ;;  %v254_v20 = vld [vmem:[#allocation8 + $0x110] sm:$0xff]  ;;  %v241_v24 = vld [vmem:[#allocation8 + $0xa8] sm:$0xff] }
  0x53   :  { %1428 = vmatpush3.bf16.msra.mxu1 %v1427_v12  ;;  %v1399_v21 = vpack.c.bf16 %v223_v19, %v222_v18  ;;  %v255_v22 = vld [vmem:[#allocation8 + $0x118] sm:$0xff]  ;;  %1398 = vmatprep.subr.bf16.mxu0 %v1397_v16  ;;  %v1401_v26 = vpack.c.bf16 %v241_v24, %v240_v23  ;;  %v272_v27 = vld [vmem:[#allocation8 + $0x1a0] sm:$0xff]  ;;  %v273_v28 = vld [vmem:[#allocation8 + $0x1a8] sm:$0xff] }
  0x54   :  { %1430 = vmatprep.subr.bf16.mxu1 %v1429_v17  ;;  %v1431_v25 = vpack.c.bf16 %v255_v22, %v254_v20  ;;  %v224_v29 = vld [vmem:[#allocation8 + $0x20] sm:$0xff]  ;;  %v1433_v30 = vpack.c.bf16 %v273_v28, %v272_v27  ;;  %v225_v31 = vld [vmem:[#allocation8 + $0x28] sm:$0xff]  ;;  %v242_v35 = vld [vmem:[#allocation8 + $0xb0] sm:$0xff]  ;;  %v1900_v22 = vsub.s32 %v362_v4, %v364_v5 }
  0x55   :  { %v256_v32 = vld [vmem:[#allocation8 + $0x120] sm:$0xff]  ;;  %v257_v33 = vld [vmem:[#allocation8 + $0x128] sm:$0xff]  ;;  %v1403_v34 = vpack.c.bf16 %v225_v31, %v224_v29  ;;  %v243_v36 = vld [vmem:[#allocation8 + $0xb8] sm:$0xff] }
  0x56   :  { %1400 = vmatpush3.bf16.msra.mxu0 %v1399_v21  ;;  %v274_v37 = vld [vmem:[#allocation8 + $0x1b0] sm:$0xff]  ;;  %v1435_v38 = vpack.c.bf16 %v257_v33, %v256_v32  ;;  %v1405_v39 = vpack.c.bf16 %v243_v36, %v242_v35  ;;  %v275_v40 = vld [vmem:[#allocation8 + $0x1b8] sm:$0xff]  ;;  %v244_v46 = vld [vmem:[#allocation8 + $0xc0] sm:$0xff] }
  0x57   :  { %1432 = vmatpush3.bf16.msra.mxu1 %v1431_v25  ;;  %1402 = vmatprep.subr.bf16.mxu0 %v1401_v26  ;;  %v226_v41 = vld [vmem:[#allocation8 + $0x30] sm:$0xff]  ;;  %v227_v42 = vld [vmem:[#allocation8 + $0x38] sm:$0xff]  ;;  %v1437_v43 = vpack.c.bf16 %v275_v40, %v274_v37  ;;  %v245_v47 = vld [vmem:[#allocation8 + $0xc8] sm:$0xff] }
  0x58   :  { %1434 = vmatprep.subr.bf16.mxu1 %v1433_v30  ;;  %v258_v44 = vld [vmem:[#allocation8 + $0x130] sm:$0xff]  ;;  %v259_v45 = vld [vmem:[#allocation8 + $0x138] sm:$0xff]  ;;  %v276_v48 = vld [vmem:[#allocation8 + $0x1c0] sm:$0xff]  ;;  %v1407_v50 = vpack.c.bf16 %v227_v42, %v226_v41  ;;  %v1409_v55 = vpack.c.bf16 %v245_v47, %v244_v46 }
  0x59   :  { %v277_v49 = vld [vmem:[#allocation8 + $0x1c8] sm:$0xff]  ;;  %v1439_v54 = vpack.c.bf16 %v259_v45, %v258_v44  ;;  %v228_v56 = vld [vmem:[#allocation8 + $0x40] sm:$0xff]  ;;  %v246_v61 = vld [vmem:[#allocation8 + $0xd0] sm:$0xff] }
  0x5a   :  { %1404 = vmatpush3.bf16.msra.mxu0 %v1403_v34  ;;  %v229_v57 = vld [vmem:[#allocation8 + $0x48] sm:$0xff]  ;;  %v260_v58 = vld [vmem:[#allocation8 + $0x140] sm:$0xff]  ;;  %v1441_v59 = vpack.c.bf16 %v277_v49, %v276_v48  ;;  %v247_v62 = vld [vmem:[#allocation8 + $0xd8] sm:$0xff] }
  0x5b   :  { %1436 = vmatpush3.bf16.msra.mxu1 %v1435_v38  ;;  %1406 = vmatprep.subr.bf16.mxu0 %v1405_v39  ;;  %v261_v60 = vld [vmem:[#allocation8 + $0x148] sm:$0xff]  ;;  %v278_v63 = vld [vmem:[#allocation8 + $0x1d0] sm:$0xff]  ;;  %v279_v0 = vld [vmem:[#allocation8 + $0x1d8] sm:$0xff]  ;;  %v1411_v1 = vpack.c.bf16 %v229_v57, %v228_v56  ;;  %v1413_v7 = vpack.c.bf16 %v247_v62, %v246_v61 }
  0x5c   :  { %1438 = vmatprep.subr.bf16.mxu1 %v1437_v43  ;;  %v230_v2 = vld [vmem:[#allocation8 + $0x50] sm:$0xff]  ;;  %v231_v3 = vld [vmem:[#allocation8 + $0x58] sm:$0xff]  ;;  %v1443_v6 = vpack.c.bf16 %v261_v60, %v260_v58  ;;  %v248_v10 = vld [vmem:[#allocation8 + $0xe0] sm:$0xff]  ;;  %v1445_v11 = vpack.c.bf16 %v279_v0, %v278_v63 }
  0x5d   :  { %v262_v8 = vld [vmem:[#allocation8 + $0x150] sm:$0xff]  ;;  %v263_v9 = vld [vmem:[#allocation8 + $0x158] sm:$0xff]  ;;  %v249_v12 = vld [vmem:[#allocation8 + $0xe8] sm:$0xff]  ;;  %v1415_v18 = vpack.c.bf16 %v231_v3, %v230_v2 }
  0x5e   :  { %1408 = vmatpush3.bf16.msra.mxu0 %v1407_v50  ;;  %v280_v13 = vld [vmem:[#allocation8 + $0x1e0] sm:$0xff]  ;;  %v281_v14 = vld [vmem:[#allocation8 + $0x1e8] sm:$0xff]  ;;  %v250_v20 = vld [vmem:[#allocation8 + $0xf0] sm:$0xff]  ;;  %v1447_v23 = vpack.c.bf16 %v263_v9, %v262_v8  ;;  %v1417_v24 = vpack.c.bf16 %v249_v12, %v248_v10 }
  0x5f   :  { %1440 = vmatpush3.bf16.msra.mxu1 %v1439_v54  ;;  %1410 = vmatprep.subr.bf16.mxu0 %v1409_v55  ;;  %v232_v15 = vld [vmem:[#allocation8 + $0x60] sm:$0xff]  ;;  %v233_v16 = vld [vmem:[#allocation8 + $0x68] sm:$0xff]  ;;  %v251_v21 = vld [vmem:[#allocation8 + $0xf8] sm:$0xff]  ;;  %v1449_v27 = vpack.c.bf16 %v281_v14, %v280_v13 }
  0x60   :  { %1442 = vmatprep.subr.bf16.mxu1 %v1441_v59  ;;  %v264_v17 = vld [vmem:[#allocation8 + $0x160] sm:$0xff]  ;;  %v265_v19 = vld [vmem:[#allocation8 + $0x168] sm:$0xff]  ;;  %v282_v25 = vld [vmem:[#allocation8 + $0x1f0] sm:$0xff]  ;;  %v1419_v32 = vpack.c.bf16 %v233_v16, %v232_v15  ;;  %v1421_v34 = vpack.c.bf16 %v251_v21, %v250_v20 }
  0x61   :  { %v283_v26 = vld [vmem:[#allocation8 + $0x1f8] sm:$0xff]  ;;  %v1661_v28 = vld [vmem:[#allocation5] ss:$16 sps:$4 sm:$0xff]   ;;  %v1665_v30 = vld [vmem:[#allocation5 + $0x4] ss:$16 sps:$4 sm:$0xff]   ;;  %v1451_v33 = vpack.c.bf16 %v265_v19, %v264_v17 }
  0x62   :  { %1412 = vmatpush3.bf16.msra.mxu0 %v1411_v1  ;;  %v1663_v29 = vld [vmem:[#allocation5 + $0x20] ss:$16 sps:$4 sm:$0xff]   ;;  %v1666_v31 = vld [vmem:[#allocation5 + $0x24] ss:$16 sps:$4 sm:$0xff]   ;;  %v366_v35 = vrot.slane %v1661_v28, %v1900_v22  ;;  %v235_v37 = vld [vmem:[#allocation8 + $0x78] sm:$0xff]  ;;  %v373_v40 = vrot.slane %v1665_v30, %v1900_v22  ;;  %v1453_v42 = vpack.c.bf16 %v283_v26, %v282_v25 }
  0x63   :  { %1444 = vmatpush3.bf16.msra.mxu1 %v1443_v6  ;;  %1414 = vmatprep.subr.bf16.mxu0 %v1413_v7  ;;  %v234_v36 = vld [vmem:[#allocation8 + $0x70] sm:$0xff]  ;;  %v380_v39 = vrot.slane %v1663_v29, %v1900_v22  ;;  %v387_v41 = vrot.slane %v1666_v31, %v1900_v22  ;;  %v267_v43 = vld [vmem:[#allocation8 + $0x178] sm:$0xff]  ;;  %v300_v44 = vld [vmem:[#allocation8 + $0x280] sm:$0xff] }
  0x64   :  { %1446 = vmatprep.subr.bf16.mxu1 %v1445_v11  ;;  %v266_v38 = vld [vmem:[#allocation8 + $0x170] sm:$0xff]  ;;  %v301_v45 = vld [vmem:[#allocation8 + $0x288] sm:$0xff]  ;;  %v332_v48 = vld [vmem:[#allocation8 + $0x380] sm:$0xff]  ;;  %v1423_v50 = vpack.c.bf16 %v235_v37, %v234_v36 }
  0x65   :  { %v389_v46 = vcombine.high %v366_v35, %v380_v39  ;;  %v391_v47 = vcombine.high %v373_v40, %v387_v41  ;;  %v333_v49 = vld [vmem:[#allocation8 + $0x388] sm:$0xff]  ;;  %v1455_v51 = vpack.c.bf16 %v267_v43, %v266_v38  ;;  %v1457_v52 = vpack.c.bf16 %v301_v45, %v300_v44  ;;  %v284_v53 = vld [vmem:[#allocation8 + $0x200] sm:$0xff]  ;;  %v302_v58 = vld [vmem:[#allocation8 + $0x290] sm:$0xff] }
  0x66   :  { %1416 = vmatpush3.bf16.msra.mxu0 %v1415_v18  ;;  %v285_v54 = vld [vmem:[#allocation8 + $0x208] sm:$0xff]  ;;  %v316_v55 = vld [vmem:[#allocation8 + $0x300] sm:$0xff]  ;;  %v1489_v56 = vpack.c.bf16 %v333_v49, %v332_v48  ;;  %v303_v59 = vld [vmem:[#allocation8 + $0x298] sm:$0xff]  ;;  %v388_v60 = vcombine.low %v366_v35, %v380_v39  ;;  %v390_v63 = vcombine.low %v373_v40, %v387_v41 }
  0x67   :  { %1448 = vmatpush3.bf16.msra.mxu1 %v1447_v23  ;;  %1418 = vmatprep.subr.bf16.mxu0 %v1417_v24  ;;  %v317_v57 = vld [vmem:[#allocation8 + $0x308] sm:$0xff]  ;;  %v334_v61 = vld [vmem:[#allocation8 + $0x390] sm:$0xff]  ;;  %v335_v62 = vld [vmem:[#allocation8 + $0x398] sm:$0xff]  ;;  %v1459_v0 = vpack.c.bf16 %v285_v54, %v284_v53  ;;  %v1461_v2 = vpack.c.bf16 %v303_v59, %v302_v58 }
  0x68   :  { %1450 = vmatprep.subr.bf16.mxu1 %v1449_v27  ;;  %500 = vmatprep.mubr.f32.mxu0 %v389_v46  ;;  %v1491_v1 = vpack.c.bf16 %v317_v57, %v316_v55  ;;  %v286_v3 = vld [vmem:[#allocation8 + $0x210] sm:$0xff]  ;;  %v287_v4 = vld [vmem:[#allocation8 + $0x218] sm:$0xff]  ;;  %v1493_v6 = vpack.c.bf16 %v335_v62, %v334_v61  ;;  %v304_v8 = vld [vmem:[#allocation8 + $0x2a0] sm:$0xff] }
  0x69   :  { %570 = vmatprep.mubr.f32.mxu1 %v391_v47  ;;  %v318_v5 = vld [vmem:[#allocation8 + $0x310] sm:$0xff]  ;;  %v319_v7 = vld [vmem:[#allocation8 + $0x318] sm:$0xff]  ;;  %v305_v9 = vld [vmem:[#allocation8 + $0x2a8] sm:$0xff]  ;;  %v1463_v12 = vpack.c.bf16 %v287_v4, %v286_v3 }
  0x6a   :  { %1420 = vmatpush3.bf16.msra.mxu0 %v1419_v32  ;;  %v336_v10 = vld [vmem:[#allocation8 + $0x3a0] sm:$0xff]  ;;  %v337_v11 = vld [vmem:[#allocation8 + $0x3a8] sm:$0xff]  ;;  %v1495_v13 = vpack.c.bf16 %v319_v7, %v318_v5  ;;  %v1465_v14 = vpack.c.bf16 %v305_v9, %v304_v8  ;;  %v306_v20 = vld [vmem:[#allocation8 + $0x2b0] sm:$0xff] }
  0x6b   :  { %1452 = vmatpush3.bf16.msra.mxu1 %v1451_v33  ;;  %1422 = vmatprep.subr.bf16.mxu0 %v1421_v34  ;;  %v288_v15 = vld [vmem:[#allocation8 + $0x220] sm:$0xff]  ;;  %v289_v16 = vld [vmem:[#allocation8 + $0x228] sm:$0xff]  ;;  %v1497_v18 = vpack.c.bf16 %v337_v11, %v336_v10  ;;  %v307_v21 = vld [vmem:[#allocation8 + $0x2b8] sm:$0xff] }
  0x6c   :  { %1454 = vmatprep.subr.bf16.mxu1 %v1453_v42  ;;  %v320_v17 = vld [vmem:[#allocation8 + $0x320] sm:$0xff]  ;;  %v321_v19 = vld [vmem:[#allocation8 + $0x328] sm:$0xff]  ;;  %v338_v23 = vld [vmem:[#allocation8 + $0x3b0] sm:$0xff]  ;;  %v1467_v25 = vpack.c.bf16 %v289_v16, %v288_v15  ;;  %v1469_v27 = vpack.c.bf16 %v307_v21, %v306_v20 }
  0x6d   :  { %v339_v24 = vld [vmem:[#allocation8 + $0x3b8] sm:$0xff]  ;;  %v1499_v26 = vpack.c.bf16 %v321_v19, %v320_v17  ;;  %v290_v28 = vld [vmem:[#allocation8 + $0x230] sm:$0xff]  ;;  %v308_v33 = vld [vmem:[#allocation8 + $0x2c0] sm:$0xff] }
  0x6e   :  { %1424 = vmatpush3.bf16.msra.mxu0 %v1423_v50  ;;  %v291_v29 = vld [vmem:[#allocation8 + $0x238] sm:$0xff]  ;;  %v322_v30 = vld [vmem:[#allocation8 + $0x330] sm:$0xff]  ;;  %v1501_v31 = vpack.c.bf16 %v339_v24, %v338_v23  ;;  %v309_v34 = vld [vmem:[#allocation8 + $0x2c8] sm:$0xff] }
  0x6f   :  { %1456 = vmatpush3.bf16.msra.mxu1 %v1455_v51  ;;  %1458 = vmatprep.subr.bf16.mxu0 %v1457_v52  ;;  %v323_v32 = vld [vmem:[#allocation8 + $0x338] sm:$0xff]  ;;  %v292_v35 = vld [vmem:[#allocation8 + $0x240] sm:$0xff]  ;;  %v293_v36 = vld [vmem:[#allocation8 + $0x248] sm:$0xff]  ;;  %v1471_v39 = vpack.c.bf16 %v291_v29, %v290_v28  ;;  %v1473_v44 = vpack.c.bf16 %v309_v34, %v308_v33 }
  0x70   :  { %1490 = vmatprep.subr.bf16.mxu1 %v1489_v56  ;;  %v340_v37 = vld [vmem:[#allocation8 + $0x3c0] sm:$0xff]  ;;  %v341_v38 = vld [vmem:[#allocation8 + $0x3c8] sm:$0xff]  ;;  %v310_v42 = vld [vmem:[#allocation8 + $0x2d0] sm:$0xff]  ;;  %v1503_v43 = vpack.c.bf16 %v323_v32, %v322_v30  ;;  %v1475_v51 = vpack.c.bf16 %v293_v36, %v292_v35 }
  0x71   :  { %501 = vmatmul.mubr.f32.vlgmr.msra.gmra.mrb[0].mxu0 %v388_v60  ;;  %v324_v40 = vld [vmem:[#allocation8 + $0x340] sm:$0xff]  ;;  %v325_v41 = vld [vmem:[#allocation8 + $0x348] sm:$0xff]  ;;  %v311_v45 = vld [vmem:[#allocation8 + $0x2d8] sm:$0xff]  ;;  %v1505_v46 = vpack.c.bf16 %v341_v38, %v340_v37 }
  0x72   :  { %571 = vmatmul.mubr.f32.vlgmr.msra.gmra.mrb[0].mxu1 %v390_v63  ;;  %1460 = vmatpush3.bf16.msra.mxu0 %v1459_v0  ;;  %v1667_v47 = vld [vmem:[#allocation5 + $0x8] ss:$16 sps:$4 sm:$0xff]   ;;  %v342_v48 = vld [vmem:[#allocation8 + $0x3d0] sm:$0xff]  ;;  %v1671_v53 = vld [vmem:[#allocation5 + $0xc] ss:$16 sps:$4 sm:$0xff]   ;;  %v1507_v55 = vpack.c.bf16 %v325_v41, %v324_v40  ;;  %v1477_v56 = vpack.c.bf16 %v311_v45, %v310_v42 }
  0x73   :  { %1492 = vmatpush3.bf16.msra.mxu1 %v1491_v1  ;;  %1462 = vmatprep.subr.bf16.mxu0 %v1461_v2  ;;  %v343_v49 = vld [vmem:[#allocation8 + $0x3d8] sm:$0xff]  ;;  %v1907_v52 = vrot.slane %v1667_v47, %v1900_v22  ;;  %v294_v57 = vld [vmem:[#allocation8 + $0x250] sm:$0xff]  ;;  %v312_v63 = vld [vmem:[#allocation8 + $0x2e0] sm:$0xff]  ;;  %v1913_v1 = vrot.slane %v1671_v53, %v1900_v22 }
  0x74   :  { %1494 = vmatprep.subr.bf16.mxu1 %v1493_v6  ;;  %v1669_v50 = vld [vmem:[#allocation5 + $0x28] ss:$16 sps:$4 sm:$0xff]   ;;  %v1672_v54 = vld [vmem:[#allocation5 + $0x2c] ss:$16 sps:$4 sm:$0xff]   ;;  %v326_v59 = vld [vmem:[#allocation8 + $0x350] sm:$0xff]  ;;  %v1509_v61 = vpack.c.bf16 %v343_v49, %v342_v48 }
  0x75   :  { %v295_v58 = vld [vmem:[#allocation8 + $0x258] sm:$0xff]  ;;  %v1910_v60 = vrot.slane %v1669_v50, %v1900_v22  ;;  %v313_v0 = vld [vmem:[#allocation8 + $0x2e8] sm:$0xff]  ;;  %v1916_v2 = vrot.slane %v1672_v54, %v1900_v22  ;;  %v344_v3 = vld [vmem:[#allocation8 + $0x3e0] sm:$0xff] }
  0x76   :  { %1464 = vmatpush3.bf16.msra.mxu0 %v1463_v12  ;;  %v327_v62 = vld [vmem:[#allocation8 + $0x358] sm:$0xff]  ;;  %v345_v4 = vld [vmem:[#allocation8 + $0x3e8] sm:$0xff]  ;;  %v1479_v6 = vpack.c.bf16 %v295_v58, %v294_v57  ;;  %v1481_v9 = vpack.c.bf16 %v313_v0, %v312_v63  ;;  %v296_v10 = vld [vmem:[#allocation8 + $0x260] sm:$0xff] }
  0x77   :  { %1496 = vmatpush3.bf16.msra.mxu1 %v1495_v13  ;;  %1466 = vmatprep.subr.bf16.mxu0 %v1465_v14  ;;  %v425_v5 = vcombine.high %v1907_v52, %v1910_v60  ;;  %v427_v7 = vcombine.high %v1913_v1, %v1916_v2  ;;  %v1511_v8 = vpack.c.bf16 %v327_v62, %v326_v59  ;;  %v297_v11 = vld [vmem:[#allocation8 + $0x268] sm:$0xff]  ;;  %v328_v12 = vld [vmem:[#allocation8 + $0x360] sm:$0xff]  ;;  %v314_v15 = vld [vmem:[#allocation8 + $0x2f0] sm:$0xff] }
  0x78   :  { %1498 = vmatprep.subr.bf16.mxu1 %v1497_v18  ;;  %v1513_v13 = vpack.c.bf16 %v345_v4, %v344_v3  ;;  %v329_v14 = vld [vmem:[#allocation8 + $0x368] sm:$0xff]  ;;  %v315_v16 = vld [vmem:[#allocation8 + $0x2f8] sm:$0xff]  ;;  %v346_v17 = vld [vmem:[#allocation8 + $0x3f0] sm:$0xff]  ;;  %v1483_v19 = vpack.c.bf16 %v297_v11, %v296_v10  ;;  %v424_v42 = vcombine.low %v1907_v52, %v1910_v60 }
  0x79   :  { %640 = vmatprep.mubr.f32.mxu0 %v425_v5  ;;  %v347_v18 = vld [vmem:[#allocation8 + $0x3f8] sm:$0xff]  ;;  %710 = vmatprep.mubr.f32.mxu1 %v427_v7  ;;  %v1515_v20 = vpack.c.bf16 %v329_v14, %v328_v12  ;;  %v1485_v21 = vpack.c.bf16 %v315_v16, %v314_v15  ;;  %v298_v23 = vld [vmem:[#allocation8 + $0x270] sm:$0xff]  ;;  %v100_v28 = vld [vmem:[#allocation7 + $0x80] sm:$0xff] }
  0x7a   :  { %1468 = vmatpush3.bf16.msra.mxu0 %v1467_v25  ;;  %v299_v24 = vld [vmem:[#allocation8 + $0x278] sm:$0xff]  ;;  %v330_v25 = vld [vmem:[#allocation8 + $0x370] sm:$0xff]  ;;  %v101_v29 = vld [vmem:[#allocation7 + $0x88] sm:$0xff] }
  0x7b   :  { %1500 = vmatpush3.bf16.msra.mxu1 %v1499_v26  ;;  %1470 = vmatprep.subr.bf16.mxu0 %v1469_v27  ;;  %v1517_v26 = vpack.c.bf16 %v347_v18, %v346_v17  ;;  %v331_v27 = vld [vmem:[#allocation8 + $0x378] sm:$0xff]  ;;  %v132_v30 = vld [vmem:[#allocation7 + $0x180] sm:$0xff]  ;;  %v1487_v32 = vpack.c.bf16 %v299_v24, %v298_v23  ;;  %v1521_v34 = vpack.c.bf16 %v101_v29, %v100_v28  ;;  %v85_v36 = vld [vmem:[#allocation7 + $0x8] sm:$0xff] }
  0x7c   :  { %1502 = vmatprep.subr.bf16.mxu1 %v1501_v31  ;;  %v133_v31 = vld [vmem:[#allocation7 + $0x188] sm:$0xff]  ;;  %v1519_v33 = vpack.c.bf16 %v331_v27, %v330_v25  ;;  %v84_v35 = vld [vmem:[#allocation7] sm:$0xff]  ;;  %v102_v40 = vld [vmem:[#allocation7 + $0x90] sm:$0xff] }
  0x7d   :  { %v116_v37 = vld [vmem:[#allocation7 + $0x100] sm:$0xff]  ;;  %v1553_v38 = vpack.c.bf16 %v133_v31, %v132_v30  ;;  %v103_v41 = vld [vmem:[#allocation7 + $0x98] sm:$0xff]  ;;  %v1523_v45 = vpack.c.bf16 %v85_v36, %v84_v35  ;;  %v86_v49 = vld [vmem:[#allocation7 + $0x10] sm:$0xff] }
  0x7e   :  { %1472 = vmatpush3.bf16.msra.mxu0 %v1471_v39  ;;  %v117_v39 = vld [vmem:[#allocation7 + $0x108] sm:$0xff]  ;;  %v1525_v48 = vpack.c.bf16 %v103_v41, %v102_v40  ;;  %v87_v50 = vld [vmem:[#allocation7 + $0x18] sm:$0xff]  ;;  %v88_v52 = vld [vmem:[#allocation7 + $0x20] sm:$0xff] }
  0x7f   :  { %1504 = vmatpush3.bf16.msra.mxu1 %v1503_v43  ;;  %1474 = vmatprep.subr.bf16.mxu0 %v1473_v44  ;;  %v134_v43 = vld [vmem:[#allocation7 + $0x190] sm:$0xff]  ;;  %v135_v44 = vld [vmem:[#allocation7 + $0x198] sm:$0xff]  ;;  %v1555_v47 = vpack.c.bf16 %v117_v39, %v116_v37  ;;  %v89_v57 = vld [vmem:[#allocation7 + $0x28] sm:$0xff]  ;;  %v1527_v60 = vpack.c.bf16 %v87_v50, %v86_v49 }
  0x80   :  { %1506 = vmatprep.subr.bf16.mxu1 %v1505_v46  ;;  %v426_v46 = vcombine.low %v1913_v1, %v1916_v2  ;;  %v1557_v53 = vpack.c.bf16 %v135_v44, %v134_v43  ;;  %v119_v54 = vld [vmem:[#allocation7 + $0x118] sm:$0xff]  ;;  %v136_v58 = vld [vmem:[#allocation7 + $0x1a0] sm:$0xff]  ;;  %v137_v59 = vld [vmem:[#allocation7 + $0x1a8] sm:$0xff] }
  0x81   :  { %v121_v62 = vld [vmem:[#allocation7 + $0x128] sm:$0xff]  ;;  %v106_v63 = vld [vmem:[#allocation7 + $0xb0] sm:$0xff]  ;;  %v107_v2 = vld [vmem:[#allocation7 + $0xb8] sm:$0xff]  ;;  %v1561_v3 = vpack.c.bf16 %v137_v59, %v136_v58 }
  0x82   :  { %1476 = vmatpush3.bf16.msra.mxu0 %v1475_v51  ;;  %v118_v51 = vld [vmem:[#allocation7 + $0x110] sm:$0xff]  ;;  %v91_v15 = vld [vmem:[#allocation7 + $0x38] sm:$0xff]  ;;  %v140_v25 = vld [vmem:[#allocation7 + $0x1c0] sm:$0xff] }
  0x83   :  { %1508 = vmatpush3.bf16.msra.mxu1 %v1507_v55  ;;  %1478 = vmatprep.subr.bf16.mxu0 %v1477_v56  ;;  %v104_v55 = vld [vmem:[#allocation7 + $0xa0] sm:$0xff]  ;;  %v105_v56 = vld [vmem:[#allocation7 + $0xa8] sm:$0xff]  ;;  %v1559_v0 = vpack.c.bf16 %v119_v54, %v118_v51  ;;  %v138_v5 = vld [vmem:[#allocation7 + $0x1b0] sm:$0xff] }
  0x84   :  { %1510 = vmatprep.subr.bf16.mxu1 %v1509_v61  ;;  %v120_v61 = vld [vmem:[#allocation7 + $0x120] sm:$0xff]  ;;  %v1529_v1 = vpack.c.bf16 %v105_v56, %v104_v55  ;;  %v90_v14 = vld [vmem:[#allocation7 + $0x30] sm:$0xff]  ;;  %v125_v36 = vld [vmem:[#allocation7 + $0x148] sm:$0xff] }
  0x85   :  { %v1673_v4 = vld [vmem:[#allocation2] ss:$16 sps:$4 sm:$0xff]   ;;  %v1677_v10 = vld [vmem:[#allocation2 + $0x4] ss:$16 sps:$4 sm:$0xff]   ;;  %v1563_v12 = vpack.c.bf16 %v121_v62, %v120_v61  ;;  %v1535_v28 = vpack.c.bf16 %v91_v15, %v90_v14  ;;  %v143_v40 = vld [vmem:[#allocation7 + $0x1d8] sm:$0xff] }
  0x86   :  { %1480 = vmatpush3.bf16.msra.mxu0 %v1479_v6  ;;  %v139_v6 = vld [vmem:[#allocation7 + $0x1b8] sm:$0xff]  ;;  %v1675_v7 = vld [vmem:[#allocation2 + $0x20] ss:$16 sps:$4 sm:$0xff]   ;;  %v1678_v11 = vld [vmem:[#allocation2 + $0x24] ss:$16 sps:$4 sm:$0xff]   ;;  %v1933_v23 = vrot.slane %v1677_v10, %v1900_v22 }
  0x87   :  { %1512 = vmatpush3.bf16.msra.mxu1 %v1511_v8  ;;  %1482 = vmatprep.subr.bf16.mxu0 %v1481_v9  ;;  %v1531_v8 = vpack.c.bf16 %v89_v57, %v88_v52  ;;  %v1927_v9 = vrot.slane %v1673_v4, %v1900_v22  ;;  %v122_v16 = vld [vmem:[#allocation7 + $0x130] sm:$0xff]  ;;  %v1930_v17 = vrot.slane %v1675_v7, %v1900_v22  ;;  %v112_v49 = vld [vmem:[#allocation7 + $0xe0] sm:$0xff]  ;;  %v113_v50 = vld [vmem:[#allocation7 + $0xe8] sm:$0xff] }
  0x88   :  { %1514 = vmatprep.subr.bf16.mxu1 %v1513_v13  ;;  %v1533_v13 = vpack.c.bf16 %v107_v2, %v106_v63  ;;  %v1565_v18 = vpack.c.bf16 %v139_v6, %v138_v5  ;;  %v1936_v24 = vrot.slane %v1678_v11, %v1900_v22  ;;  %v110_v37 = vld [vmem:[#allocation7 + $0xd0] sm:$0xff]  ;;  %v144_v51 = vld [vmem:[#allocation7 + $0x1e0] sm:$0xff]  ;;  %v1545_v56 = vpack.c.bf16 %v113_v50, %v112_v49  ;;  %v97_v57 = vld [vmem:[#allocation7 + $0x68] sm:$0xff] }
  0x89   :  { %v757_v27 = vcombine.high %v1927_v9, %v1930_v17  ;;  %v142_v39 = vld [vmem:[#allocation7 + $0x1d0] sm:$0xff]  ;;  %v96_v52 = vld [vmem:[#allocation7 + $0x60] sm:$0xff]  ;;  %v115_v62 = vld [vmem:[#allocation7 + $0xf8] sm:$0xff] }
  0x8a   :  { %1484 = vmatpush3.bf16.msra.mxu0 %v1483_v19  ;;  %v123_v19 = vld [vmem:[#allocation7 + $0x138] sm:$0xff]  ;;  %v759_v29 = vcombine.high %v1933_v23, %v1936_v24  ;;  %v94_v44 = vld [vmem:[#allocation7 + $0x50] sm:$0xff]  ;;  %v128_v58 = vld [vmem:[#allocation7 + $0x160] sm:$0xff] }
  0x8b   :  { %1516 = vmatpush3.bf16.msra.mxu1 %v1515_v20  ;;  %1486 = vmatprep.subr.bf16.mxu0 %v1485_v21  ;;  %v108_v20 = vld [vmem:[#allocation7 + $0xc0] sm:$0xff]  ;;  %v109_v21 = vld [vmem:[#allocation7 + $0xc8] sm:$0xff]  ;;  %v1567_v30 = vpack.c.bf16 %v123_v19, %v122_v16  ;;  %v114_v61 = vld [vmem:[#allocation7 + $0xf0] sm:$0xff] }
  0x8c   :  { %1518 = vmatprep.subr.bf16.mxu1 %v1517_v26  ;;  %v141_v26 = vld [vmem:[#allocation7 + $0x1c8] sm:$0xff]  ;;  %v1537_v31 = vpack.c.bf16 %v109_v21, %v108_v20  ;;  %v146_v63 = vld [vmem:[#allocation7 + $0x1f0] sm:$0xff]  ;;  %v1549_v5 = vpack.c.bf16 %v115_v62, %v114_v61  ;;  %v131_v7 = vld [vmem:[#allocation7 + $0x178] sm:$0xff] }
  0x8d   :  { %v1569_v35 = vpack.c.bf16 %v141_v26, %v140_v25  ;;  %v98_v2 = vld [vmem:[#allocation7 + $0x70] sm:$0xff]  ;;  %v165_v11 = vld [vmem:[#allocation7 + $0x288] sm:$0xff]  ;;  %v196_v14 = vld [vmem:[#allocation7 + $0x380] sm:$0xff] }
  0x8e   :  { %1488 = vmatpush3.bf16.msra.mxu0 %v1487_v32  ;;  %v92_v32 = vld [vmem:[#allocation7 + $0x40] sm:$0xff]  ;;  %v130_v6 = vld [vmem:[#allocation7 + $0x170] sm:$0xff]  ;;  %v197_v15 = vld [vmem:[#allocation7 + $0x388] sm:$0xff] }
  0x8f   :  { %1520 = vmatpush3.bf16.msra.mxu1 %v1519_v33  ;;  %1522 = vmatprep.subr.bf16.mxu0 %v1521_v34  ;;  %v93_v33 = vld [vmem:[#allocation7 + $0x48] sm:$0xff]  ;;  %v124_v34 = vld [vmem:[#allocation7 + $0x140] sm:$0xff]  ;;  %v166_v20 = vld [vmem:[#allocation7 + $0x290] sm:$0xff]  ;;  %v1583_v25 = vpack.c.bf16 %v131_v7, %v130_v6 }
  0x90   :  { %1554 = vmatprep.subr.bf16.mxu1 %v1553_v38  ;;  %v111_v38 = vld [vmem:[#allocation7 + $0xd8] sm:$0xff]  ;;  %v1539_v41 = vpack.c.bf16 %v93_v33, %v92_v32  ;;  %v180_v16 = vld [vmem:[#allocation7 + $0x300] sm:$0xff]  ;;  %v181_v19 = vld [vmem:[#allocation7 + $0x308] sm:$0xff] }
  0x91   :  { %641 = vmatmul.mubr.f32.vlgmr.msra.gmra.mrb[2].mxu0 %v424_v42  ;;  %v1571_v42 = vpack.c.bf16 %v125_v36, %v124_v34  ;;  %v1541_v43 = vpack.c.bf16 %v111_v38, %v110_v37  ;;  %v167_v21 = vld [vmem:[#allocation7 + $0x298] sm:$0xff]  ;;  %v758_v36 = vcombine.low %v1933_v23, %v1936_v24  ;;  %v1619_v37 = vpack.c.bf16 %v181_v19, %v180_v16  ;;  %v173_v6 = vld [vmem:[#allocation7 + $0x2c8] sm:$0xff]  ;;  %v204_v7 = vld [vmem:[#allocation7 + $0x3c0] sm:$0xff] }
  0x92   :  { %1524 = vmatpush3.bf16.msra.mxu0 %v1523_v45  ;;  %711 = vmatmul.mubr.f32.vlgmr.msra.gmra.mrb[2].mxu1 %v426_v46  ;;  %v95_v45 = vld [vmem:[#allocation7 + $0x58] sm:$0xff]  ;;  %v126_v46 = vld [vmem:[#allocation7 + $0x150] sm:$0xff]  ;;  %v1589_v38 = vpack.c.bf16 %v167_v21, %v166_v20 }
  0x93   :  { %1556 = vmatpush3.bf16.msra.mxu1 %v1555_v47  ;;  %1526 = vmatprep.subr.bf16.mxu0 %v1525_v48  ;;  %v1573_v47 = vpack.c.bf16 %v143_v40, %v142_v39  ;;  %v127_v48 = vld [vmem:[#allocation7 + $0x158] sm:$0xff]  ;;  %v1543_v54 = vpack.c.bf16 %v95_v45, %v94_v44  ;;  %v150_v40 = vld [vmem:[#allocation7 + $0x210] sm:$0xff]  ;;  %v168_v44 = vld [vmem:[#allocation7 + $0x2a0] sm:$0xff] }
  0x94   :  { %1558 = vmatprep.subr.bf16.mxu1 %v1557_v53  ;;  %868 = vmatprep.mubr.f32.mxu0 %v757_v27  ;;  %v145_v53 = vld [vmem:[#allocation7 + $0x1e8] sm:$0xff]  ;;  %v1575_v55 = vpack.c.bf16 %v127_v48, %v126_v46  ;;  %v198_v27 = vld [vmem:[#allocation7 + $0x390] sm:$0xff]  ;;  %v183_v24 = vld [vmem:[#allocation7 + $0x318] sm:$0xff] }
  0x95   :  { %938 = vmatprep.mubr.f32.mxu1 %v759_v29  ;;  %v1577_v59 = vpack.c.bf16 %v145_v53, %v144_v51  ;;  %v1617_v29 = vpack.c.bf16 %v197_v15, %v196_v14  ;;  %v1681_v33 = vld [vmem:[#allocation2 + $0x28] ss:$16 sps:$4 sm:$0xff]   ;;  %v1683_v34 = vld [vmem:[#allocation2 + $0xc] ss:$16 sps:$4 sm:$0xff]   ;;  %v200_v46 = vld [vmem:[#allocation7 + $0x3a0] sm:$0xff] }
  0x96   :  { %1528 = vmatpush3.bf16.msra.mxu0 %v1527_v60  ;;  %v129_v60 = vld [vmem:[#allocation7 + $0x168] sm:$0xff]  ;;  %v152_v53 = vld [vmem:[#allocation7 + $0x220] sm:$0xff]  ;;  %v174_v19 = vld [vmem:[#allocation7 + $0x2d0] sm:$0xff] }
  0x97   :  { %1560 = vmatpush3.bf16.msra.mxu1 %v1559_v0  ;;  %1530 = vmatprep.subr.bf16.mxu0 %v1529_v1  ;;  %v147_v0 = vld [vmem:[#allocation7 + $0x1f8] sm:$0xff]  ;;  %v1547_v1 = vpack.c.bf16 %v97_v57, %v96_v52  ;;  %v1579_v4 = vpack.c.bf16 %v129_v60, %v128_v58  ;;  %v169_v45 = vld [vmem:[#allocation7 + $0x2a8] sm:$0xff]  ;;  %v170_v57 = vld [vmem:[#allocation7 + $0x2b0] sm:$0xff] }
  0x98   :  { %1562 = vmatprep.subr.bf16.mxu1 %v1561_v3  ;;  %v99_v3 = vld [vmem:[#allocation7 + $0x78] sm:$0xff]  ;;  %v1581_v10 = vpack.c.bf16 %v147_v0, %v146_v63  ;;  %v1593_v51 = vpack.c.bf16 %v169_v45, %v168_v44  ;;  %v185_v52 = vld [vmem:[#allocation7 + $0x328] sm:$0xff]  ;;  %v154_v0 = vld [vmem:[#allocation7 + $0x230] sm:$0xff] }
  0x99   :  { %v171_v58 = vld [vmem:[#allocation7 + $0x2b8] sm:$0xff]  ;;  %v157_v14 = vld [vmem:[#allocation7 + $0x248] sm:$0xff]  ;;  %v188_v15 = vld [vmem:[#allocation7 + $0x340] sm:$0xff] }
  0x9a   :  { %1532 = vmatpush3.bf16.msra.mxu0 %v1531_v8  ;;  %v164_v8 = vld [vmem:[#allocation7 + $0x280] sm:$0xff]  ;;  %v203_v60 = vld [vmem:[#allocation7 + $0x3b8] sm:$0xff]  ;;  %v1597_v63 = vpack.c.bf16 %v171_v58, %v170_v57  ;;  %v206_v21 = vld [vmem:[#allocation7 + $0x3d0] sm:$0xff] }
  0x9b   :  { %1564 = vmatpush3.bf16.msra.mxu1 %v1563_v12  ;;  %1534 = vmatprep.subr.bf16.mxu0 %v1533_v13  ;;  %v148_v12 = vld [vmem:[#allocation7 + $0x200] sm:$0xff]  ;;  %v149_v13 = vld [vmem:[#allocation7 + $0x208] sm:$0xff]  ;;  %v1585_v26 = vpack.c.bf16 %v165_v11, %v164_v8  ;;  %v175_v20 = vld [vmem:[#allocation7 + $0x2d8] sm:$0xff] }
  0x9c   :  { %1566 = vmatprep.subr.bf16.mxu1 %v1565_v18  ;;  %v1551_v18 = vpack.c.bf16 %v99_v3, %v98_v2  ;;  %v1587_v32 = vpack.c.bf16 %v149_v13, %v148_v12  ;;  %v186_v2 = vld [vmem:[#allocation7 + $0x330] sm:$0xff]  ;;  %v205_v8 = vld [vmem:[#allocation7 + $0x3c8] sm:$0xff]  ;;  %v156_v13 = vld [vmem:[#allocation7 + $0x240] sm:$0xff] }
  0x9d   :  { %v1633_v16 = vpack.c.bf16 %v205_v8, %v204_v7  ;;  %v193_v45 = vld [vmem:[#allocation7 + $0x368] sm:$0xff] }
  0x9e   :  { %1536 = vmatpush3.bf16.msra.mxu0 %v1535_v28  ;;  %v199_v28 = vld [vmem:[#allocation7 + $0x398] sm:$0xff] }
  0x9f   :  { %1568 = vmatpush3.bf16.msra.mxu1 %v1567_v30  ;;  %1538 = vmatprep.subr.bf16.mxu0 %v1537_v31  ;;  %v1679_v30 = vld [vmem:[#allocation2 + $0x8] ss:$16 sps:$4 sm:$0xff]   ;;  %v756_v31 = vcombine.low %v1927_v9, %v1930_v17  ;;  %v1950_v9 = vrot.slane %v1681_v33, %v1900_v22  ;;  %v1953_v17 = vrot.slane %v1683_v34, %v1900_v22  ;;  %v176_v34 = vld [vmem:[#allocation7 + $0x2e0] sm:$0xff] }
  0xa0   :  { %1570 = vmatprep.subr.bf16.mxu1 %v1569_v35  ;;  %v1684_v35 = vld [vmem:[#allocation2 + $0x2c] ss:$16 sps:$4 sm:$0xff]   ;;  %v1947_v39 = vrot.slane %v1679_v30, %v1900_v22  ;;  %v1621_v23 = vpack.c.bf16 %v199_v28, %v198_v27  ;;  %v1605_v28 = vpack.c.bf16 %v175_v20, %v174_v19 }
  0xa1   :  { %v159_v30 = vld [vmem:[#allocation7 + $0x258] sm:$0xff] }
  0xa2   :  { %1540 = vmatpush3.bf16.msra.mxu0 %v1539_v41  ;;  %v151_v41 = vld [vmem:[#allocation7 + $0x218] sm:$0xff]  ;;  %v793_v48 = vcombine.high %v1947_v39, %v1950_v9 }
  0xa3   :  { %1572 = vmatpush3.bf16.msra.mxu1 %v1571_v42  ;;  %1542 = vmatprep.subr.bf16.mxu0 %v1541_v43  ;;  %v182_v42 = vld [vmem:[#allocation7 + $0x310] sm:$0xff]  ;;  %v1956_v43 = vrot.slane %v1684_v35, %v1900_v22  ;;  %v1591_v50 = vpack.c.bf16 %v151_v41, %v150_v40  ;;  %v191_v33 = vld [vmem:[#allocation7 + $0x358] sm:$0xff]  ;;  %v177_v35 = vld [vmem:[#allocation7 + $0x2e8] sm:$0xff] }
  0xa4   :  { %1574 = vmatprep.subr.bf16.mxu1 %v1573_v47  ;;  %v201_v47 = vld [vmem:[#allocation7 + $0x3a8] sm:$0xff]  ;;  %v1623_v22 = vpack.c.bf16 %v183_v24, %v182_v42  ;;  %v1609_v41 = vpack.c.bf16 %v177_v35, %v176_v34  ;;  %v160_v42 = vld [vmem:[#allocation7 + $0x260] sm:$0xff] }
  0xa5   :  { %v795_v49 = vcombine.high %v1953_v17, %v1956_v43  ;;  %v192_v24 = vld [vmem:[#allocation7 + $0x360] sm:$0xff] }
  0xa6   :  { %1544 = vmatpush3.bf16.msra.mxu0 %v1543_v54  ;;  %v153_v54 = vld [vmem:[#allocation7 + $0x228] sm:$0xff] }
  0xa7   :  { %1576 = vmatpush3.bf16.msra.mxu1 %v1575_v55  ;;  %1546 = vmatprep.subr.bf16.mxu0 %v1545_v56  ;;  %v184_v55 = vld [vmem:[#allocation7 + $0x320] sm:$0xff]  ;;  %v1625_v56 = vpack.c.bf16 %v201_v47, %v200_v46  ;;  %v1595_v61 = vpack.c.bf16 %v153_v54, %v152_v53  ;;  %v178_v46 = vld [vmem:[#allocation7 + $0x2f0] sm:$0xff]  ;;  %v179_v47 = vld [vmem:[#allocation7 + $0x2f8] sm:$0xff] }
  0xa8   :  { %1578 = vmatprep.subr.bf16.mxu1 %v1577_v59  ;;  %v202_v59 = vld [vmem:[#allocation7 + $0x3b0] sm:$0xff]  ;;  %v1627_v62 = vpack.c.bf16 %v185_v52, %v184_v55  ;;  %v163_v54 = vld [vmem:[#allocation7 + $0x278] sm:$0xff] }
  0xa9   :  { %v1629_v3 = vpack.c.bf16 %v203_v60, %v202_v59  ;;  %v162_v53 = vld [vmem:[#allocation7 + $0x270] sm:$0xff]  ;;  %v195_v52 = vld [vmem:[#allocation7 + $0x378] sm:$0xff]  ;;  %v792_v59 = vcombine.low %v1947_v39, %v1950_v9  ;;  %v794_v60 = vcombine.low %v1953_v17, %v1956_v43 }
  0xaa   :  { %1548 = vmatpush3.bf16.msra.mxu0 %v1547_v1  ;;  %v155_v1 = vld [vmem:[#allocation7 + $0x238] sm:$0xff]  ;;  %v1615_v57 = vpack.c.bf16 %v163_v54, %v162_v53 }
  0xab   :  { %1580 = vmatpush3.bf16.msra.mxu1 %v1579_v4  ;;  %1550 = vmatprep.subr.bf16.mxu0 %v1549_v5  ;;  %v187_v4 = vld [vmem:[#allocation7 + $0x338] sm:$0xff]  ;;  %v172_v5 = vld [vmem:[#allocation7 + $0x2c0] sm:$0xff] }
  0xac   :  { %1582 = vmatprep.subr.bf16.mxu1 %v1581_v10  ;;  %v1599_v10 = vpack.c.bf16 %v155_v1, %v154_v0  ;;  %v1631_v11 = vpack.c.bf16 %v187_v4, %v186_v2  ;;  %v1601_v12 = vpack.c.bf16 %v173_v6, %v172_v5 }
  0xae   :  { %1552 = vmatpush3.bf16.msra.mxu0 %v1551_v18  ;;  %v189_v18 = vld [vmem:[#allocation7 + $0x348] sm:$0xff] }
  0xaf   :  { %1584 = vmatpush3.bf16.msra.mxu1 %v1583_v25  ;;  %1586 = vmatprep.subr.bf16.mxu0 %v1585_v26  ;;  %v207_v25 = vld [vmem:[#allocation7 + $0x3d8] sm:$0xff]  ;;  %v1603_v26 = vpack.c.bf16 %v157_v14, %v156_v13  ;;  %v1635_v27 = vpack.c.bf16 %v189_v18, %v188_v15 }
  0xb0   :  { %1618 = vmatprep.subr.bf16.mxu1 %v1617_v29  ;;  %v158_v29 = vld [vmem:[#allocation7 + $0x250] sm:$0xff] }
  0xb1   :  { %869 = vmatmul.mubr.f32.vlgmr.msra.gmra.mrb[4].mxu0 %v756_v31  ;;  %v190_v31 = vld [vmem:[#allocation7 + $0x350] sm:$0xff] }
  0xb2   :  { %1588 = vmatpush3.bf16.msra.mxu0 %v1587_v32  ;;  %939 = vmatmul.mubr.f32.vlgmr.msra.gmra.mrb[4].mxu1 %v758_v36  ;;  %v1637_v32 = vpack.c.bf16 %v207_v25, %v206_v21  ;;  %v208_v36 = vld [vmem:[#allocation7 + $0x3e0] sm:$0xff]  ;;  %v1639_v40 = vpack.c.bf16 %v191_v33, %v190_v31 }
  0xb3   :  { %1620 = vmatpush3.bf16.msra.mxu1 %v1619_v37  ;;  %1590 = vmatprep.subr.bf16.mxu0 %v1589_v38  ;;  %v209_v37 = vld [vmem:[#allocation7 + $0x3e8] sm:$0xff]  ;;  %v1607_v38 = vpack.c.bf16 %v159_v30, %v158_v29 }
  0xb4   :  { %1622 = vmatprep.subr.bf16.mxu1 %v1621_v23  ;;  %1008 = vmatprep.mubr.f32.mxu0 %v793_v48  ;;  %v161_v23 = vld [vmem:[#allocation7 + $0x268] sm:$0xff]  ;;  %v1641_v44 = vpack.c.bf16 %v209_v37, %v208_v36  ;;  %v210_v48 = vld [vmem:[#allocation7 + $0x3f0] sm:$0xff] }
  0xb5   :  { %1078 = vmatprep.mubr.f32.mxu1 %v795_v49  ;;  %v211_v49 = vld [vmem:[#allocation7 + $0x3f8] sm:$0xff] }
  0xb6   :  { %1592 = vmatpush3.bf16.msra.mxu0 %v1591_v50  ;;  %v1611_v50 = vpack.c.bf16 %v161_v23, %v160_v42  ;;  %v1645_v55 = vpack.c.bf16 %v211_v49, %v210_v48 }
  0xb7   :  { %1624 = vmatpush3.bf16.msra.mxu1 %v1623_v22  ;;  %1594 = vmatprep.subr.bf16.mxu0 %v1593_v51  ;;  %v1643_v22 = vpack.c.bf16 %v193_v45, %v192_v24  ;;  %v1613_v51 = vpack.c.bf16 %v179_v47, %v178_v46 }
  0xb8   :  { %1626 = vmatprep.subr.bf16.mxu1 %v1625_v56  ;;  %v194_v56 = vld [vmem:[#allocation7 + $0x370] sm:$0xff] }
  0xb9   :  { %v1647_v58 = vpack.c.bf16 %v195_v52, %v194_v56 }
  0xba   :  { %1596 = vmatpush3.bf16.msra.mxu0 %v1595_v61 }
  0xbb   :  { %1628 = vmatpush3.bf16.msra.mxu1 %v1627_v62  ;;  %1598 = vmatprep.subr.bf16.mxu0 %v1597_v63 }
  0xbc   :  { %1630 = vmatprep.subr.bf16.mxu1 %v1629_v3 }
  0xbe   :  { %1600 = vmatpush3.bf16.msra.mxu0 %v1599_v10 }
  0xbf   :  { %1632 = vmatpush3.bf16.msra.mxu1 %v1631_v11  ;;  %1602 = vmatprep.subr.bf16.mxu0 %v1601_v12 }
  0xc0   :  { %1634 = vmatprep.subr.bf16.mxu1 %v1633_v16 }
  0xc2   :  { %1604 = vmatpush3.bf16.msra.mxu0 %v1603_v26 }
  0xc3   :  { %1636 = vmatpush3.bf16.msra.mxu1 %v1635_v27  ;;  %1606 = vmatprep.subr.bf16.mxu0 %v1605_v28  ;;  %v1112_v28 = vld [vmem:[%s1985_s4] ss:$0 sm:$0xff] }
  0xc4   :  { %1638 = vmatprep.subr.bf16.mxu1 %v1637_v32 }
  0xc6   :  { %1608 = vmatpush3.bf16.msra.mxu0 %v1607_v38 }
  0xc7   :  { %1640 = vmatpush3.bf16.msra.mxu1 %v1639_v40  ;;  %1610 = vmatprep.subr.bf16.mxu0 %v1609_v41 }
  0xc8   :  { %1642 = vmatprep.subr.bf16.mxu1 %v1641_v44 }
  0xca   :  { %1612 = vmatpush3.bf16.msra.mxu0 %v1611_v50 }
  0xcb   :  { %1644 = vmatpush3.bf16.msra.mxu1 %v1643_v22  ;;  %1614 = vmatprep.subr.bf16.mxu0 %v1613_v51 }
  0xcc   :  { %1646 = vmatprep.subr.bf16.mxu1 %v1645_v55 }
  0xce   :  { %1616 = vmatpush3.bf16.msra.mxu0 %v1615_v57 }
  0xcf   :  { %1648 = vmatpush3.bf16.msra.mxu1 %v1647_v58 }
  0xd1   :  { %1009 = vmatmul.mubr.f32.vlgmr.msra.gmra.mrb[6].mxu0 %v792_v59 }
  0xd2   :  { %1079 = vmatmul.mubr.f32.vlgmr.msra.gmra.mrb[6].mxu1 %v794_v60 }
 0x144   :  { %v1145_v61 = vpop.f32.mrb[0].mxu0 }
 0x145   :  { %v1180_v62 = vpop.f32.mrb[0].mxu1  ;;  %v1146_v63 = vpop.f32.mrb[1].mxu0 }
 0x146   :  { %v1147_v0 = vadd.f32 %v1146_v63, %v1145_v61  ;;  %v1181_v1 = vpop.f32.mrb[1].mxu1 }
 0x147   :  { %v1182_v2 = vadd.f32 %v1181_v1, %v1180_v62 }
 0x149   :  { %v573_v3 = vadd.f32 %v1182_v2, %v1147_v0 }
 0x164   :  { %v1215_v4 = vpop.f32.mrb[2].mxu0 }
 0x165   :  { %v1216_v5 = vpop.f32.mrb[3].mxu0  ;;  %v1250_v6 = vpop.f32.mrb[2].mxu1 }
 0x166   :  { %v1217_v7 = vadd.f32 %v1216_v5, %v1215_v4  ;;  %v1251_v8 = vpop.f32.mrb[3].mxu1 }
 0x167   :  { %v1252_v39 = vadd.f32 %v1251_v8, %v1250_v6 }
 0x168   :  { %v643_v9 = vadd.f32 %v1217_v7, %v573_v3 }
 0x16a   :  { %v713_v10 = vadd.f32 %v1252_v39, %v643_v9 }
 0x184   :  { %v1285_v11 = vpop.f32.mrb[4].mxu0 }
 0x185   :  { %v1286_v17 = vpop.f32.mrb[5].mxu0  ;;  %v1320_v43 = vpop.f32.mrb[4].mxu1 }
 0x186   :  { %v1287_v12 = vadd.f32 %v1286_v17, %v1285_v11  ;;  %v1321_v13 = vpop.f32.mrb[5].mxu1 }
 0x187   :  { %v1322_v14 = vadd.f32 %v1321_v13, %v1320_v43 }
 0x188   :  { %v871_v15 = vadd.f32 %v1287_v12, %v713_v10 }
 0x18a   :  { %v941_v16 = vadd.f32 %v1322_v14, %v871_v15 }
 0x1a4   :  { %v1355_v18 = vpop.f32.mrb[6].mxu0 }
 0x1a5   :  { %v1356_v19 = vpop.f32.mrb[7].mxu0  ;;  %v1390_v20 = vpop.f32.mrb[6].mxu1 }
 0x1a6   :  { %v1357_v21 = vadd.f32 %v1356_v19, %v1355_v18  ;;  %v1391_v25 = vpop.f32.mrb[7].mxu1 }
 0x1a7   :  { %v1392_v26 = vadd.f32 %v1391_v25, %v1390_v20 }
 0x1a8   :  { %v1011_v27 = vadd.f32 %v1357_v21, %v941_v16 }
 0x1aa   :  { %v1081_v29 = vadd.f32 %v1392_v26, %v1011_v27 }
 0x1ac   :  { %v1091_v30 = vmul.f32 %v1112_v28, %v1081_v29 }
 0x1ae   :  { %1092 = vst [vmem:[#allocation10] sm:$0xff] %v1091_v30 }
 0x1af   :  { %1097 = vsyncadd [#allocation4], 96  ;;  %s1812_s19 = smov [#allocation10]  }
 0x1b0   :  { %s1098_s20 = sshll.u32 %s1812_s19, 4  ;;  %s1099_s20 = int_to_ptr.vmem [resolvable:$true] %s1098_s20 }
 0x1b1   :  { %s1773_s21 = scalar_lea.vmem %s1099_s20, 32  ;;  %s1777_s22 = scalar_lea.vmem %s1099_s20, 128 }
 0x1b2   :  { %p1774_p4 = scmp.ne.s32.totalorder %s1099_s20, %s1773_s21  ;;  %p1778_p5 = scmp.lt.s32.totalorder %s1099_s20, %s1099_s20 }
 0x1b3   :  { %p1779_p6 = scmp.lt.s32.totalorder %s1777_s22, %s1773_s21 }
 0x1b5   :  { %p1780_p7 = por %p1779_p6, %p1778_p5 }
 0x1b7   :  { %p1781_p8 = pnand %p1780_p7, %p1774_p4 }
 0x1b9   :  { %1784 = shalt.err (!%p1781_p8)
}
 0x1ba   :  { %s1785_s25 = scalar_lea.hbm %s1986_s5, 32 }
 0x1bb   :  { %p1786_p9 = scmp.ne.s32.totalorder %s1986_s5, %s1785_s25  ;;  %p1789_p10 = scmp.lt.u32.totalorder %s1785_s25, %s1986_s5 }
 0x1bd   :  { %p1791_p11 = pnand %p1789_p10, %p1786_p9 }
 0x1bf   :  { %1794 = shalt.err (!%p1791_p11)
}
 0x1c0   :  { %s1813_s6 = smov 32   ;;  %s1814_s1 = smov 2  }
 0x1c1   :  { %1104 = dma.vmem_to_hbm [thread:$0]  %s1099_s20, 32, %s1986_s5, [#allocation4], %s1813_s6, %s1813_s6, %s1814_s1  }
 0x1c2   :  { %1801 = dma.done.wait [#allocation4], 128  }
 0x1c3   :  { %1802 = vsyncadd [#allocation4], 4294967168 }
 0x1c4   :  { %1108 = vsyncpa [#allocation3], 1 }
 0x1c5   :  { %1109 = vsyncpa [#allocation6], 1 }
 0x1c6   :  { %1110 = vsyncpa [#allocation9], 1 }
 0x1c7   :  { %1111 = vsyncpa [#allocation4], 1 }

</bundles_post_ra>
